<compile_context>
chip_gen: v7x
topology: tpu7x:2x2x1
jax: 0.10.0
libtpu: 0.0.40
codegen_flags: <defaults>
</compile_context>

<pallas_src>
import functools

import jax
import jax.numpy as jnp
from jax.experimental import pallas as pl
from jax.experimental.pallas import tpu as pltpu

_LANE = 1024                        # lane-dense flatten width (multiple of 128)
_MAX_TILE_BYTES = 4 * 1024 * 1024   # per-array tile cap (v7x 64 MiB VMEM safe)
_VMEM_LIMIT = 32 * 1024 * 1024      # 3 arrays x 2 buffers x 4 MiB + headroom


def _sublane(dtype):
    # f32 -> 8, bf16 -> 16, 8-bit -> 32 row multiple for packed tiles.
    return max(8, 32 // jnp.dtype(dtype).itemsize)


def _round_up(x, m):
    return ((x + m - 1) // m) * m


@functools.lru_cache(maxsize=1)
def _is_v7x():
    try:
        return "v7" in jax.devices()[0].device_kind.lower()
    except Exception:
        return False


def lsoft_loss_kernel(beta_ref, y_pred_ref, y_true_ref, out_ref):
    beta = beta_ref[0]                               # scalar from SMEM
    p = y_pred_ref[...].astype(jnp.float32)          # upcast in-kernel (free on VPU)
    t = y_true_ref[...].astype(jnp.float32)

    # Target construction ("no_grad" in PyTorch; forward-only here).
    t_upd = (beta * t + (1.0 - beta) * p) * t

    # binary_cross_entropy, reduction='none', PyTorch clamps each log at -100.
    log_p = jnp.maximum(jnp.log(p), -100.0)
    log_1mp = jnp.maximum(jnp.log(1.0 - p), -100.0)
    # -(t*log_p + (1-t)*log_1mp) == -log_1mp - t*(log_p - log_1mp)
    out_ref[...] = (-log_1mp - t_upd * (log_p - log_1mp)).astype(out_ref.dtype)


def _run_kernel(p2, t2, beta, out_dtype):
    """Run the elementwise kernel on a 2-D (rows, cols) view; cols % 128 == 0."""
    rows, cols = p2.shape
    isizes = [jnp.dtype(p2.dtype).itemsize,
              jnp.dtype(t2.dtype).itemsize,
              jnp.dtype(out_dtype).itemsize]
    max_isize = max(isizes)
    sub = max(_sublane(p2.dtype), _sublane(t2.dtype), _sublane(out_dtype))

    # Largest row-tile such that a single array tile stays <= _MAX_TILE_BYTES.
    cap = max(sub, ((_MAX_TILE_BYTES // (cols * max_isize)) // sub) * sub)

    want_split = _is_v7x() and rows >= 2 * sub
    if rows <= cap and not want_split:
        # Single full-extent block (legal even if rows isn't sublane-aligned).
        tile_rows = rows
    else:
        if _is_v7x():
            # Balanced, even number of blocks so both TensorCores get work.
            n_target = max(2, 2 * pl.cdiv(rows, 2 * cap))
            tile_rows = min(cap, _round_up(pl.cdiv(rows, n_target), sub))
        else:
            # Single-TC v5e/v6e: largest tile, minimal grid steps.
            tile_rows = min(cap, _round_up(rows, sub))
        if tile_rows >= rows:
            tile_rows = rows
    n_steps = pl.cdiv(rows, tile_rows)

    beta_arr = jnp.asarray(beta, jnp.float32).reshape(1)

    return pl.pallas_call(
        lsoft_loss_kernel,
        out_shape=jax.ShapeDtypeStruct((rows, cols), out_dtype),
        grid=(n_steps,),
        in_specs=[
            pl.BlockSpec(memory_space=pltpu.MemorySpace.SMEM),   # beta scalar
            pl.BlockSpec((tile_rows, cols), lambda i: (i, 0)),   # y_pred tile
            pl.BlockSpec((tile_rows, cols), lambda i: (i, 0)),   # y_true tile
        ],
        out_specs=pl.BlockSpec((tile_rows, cols), lambda i: (i, 0)),
        compiler_params=pltpu.CompilerParams(
            dimension_semantics=("parallel",),
            vmem_limit_bytes=_VMEM_LIMIT,
        ),
    )(beta_arr, p2, t2)


def _lsoft_loss_jax(p, t, beta):
    """Plain-JAX fallback for tiny ragged tails (< _LANE elements)."""
    p32 = p.astype(jnp.float32)
    t32 = t.astype(jnp.float32)
    b = jnp.float32(beta)
    t_upd = (b * t32 + (1.0 - b) * p32) * t32
    log_p = jnp.maximum(jnp.log(p32), -100.0)
    log_1mp = jnp.maximum(jnp.log(1.0 - p32), -100.0)
    return -log_1mp - t_upd * (log_p - log_1mp)


def lsoft_loss(y_pred, y_true, beta):
    """Elementwise L-soft BCE loss. y_pred, y_true: same shape, p in [0,1]."""
    assert y_pred.shape == y_true.shape
    orig_shape = y_pred.shape
    total = int(y_pred.size)
    out_dtype = y_pred.dtype
    if total == 0:
        return jnp.zeros(orig_shape, out_dtype)

    # Fast path 1: flattened size is lane-aligned -> free reshape, no pad/slice.
    if total % _LANE == 0:
        rows = total // _LANE
        out2 = _run_kernel(y_pred.reshape(rows, _LANE),
                           y_true.reshape(rows, _LANE), beta, out_dtype)
        return out2.reshape(orig_shape)

    # Fast path 2: original last dim already lane-aligned (%128) and a minimal
    # tile of it fits the per-array VMEM budget -> use that 2-D view directly.
    if len(orig_shape) >= 2 and orig_shape[-1] % 128 == 0:
        cols = int(orig_shape[-1])
        max_isize = max(jnp.dtype(y_pred.dtype).itemsize,
                        jnp.dtype(y_true.dtype).itemsize,
                        jnp.dtype(out_dtype).itemsize)
        sub = max(_sublane(y_pred.dtype), _sublane(y_true.dtype),
                  _sublane(out_dtype))
        if cols * max_isize * sub <= _MAX_TILE_BYTES:
            rows = total // cols
            out2 = _run_kernel(y_pred.reshape(rows, cols),
                               y_true.reshape(rows, cols), beta, out_dtype)
            return out2.reshape(orig_shape)

    # Ragged: kernel on the lane-aligned prefix, <_LANE-element tail in JAX.
    p_flat = y_pred.reshape(-1)
    t_flat = y_true.reshape(-1)
    main = (total // _LANE) * _LANE
    if main == 0:
        out = _lsoft_loss_jax(p_flat, t_flat, beta).astype(out_dtype)
        return out.reshape(orig_shape)
    out_main = _run_kernel(p_flat[:main].reshape(main // _LANE, _LANE),
                           t_flat[:main].reshape(main // _LANE, _LANE),
                           beta, out_dtype).reshape(-1)
    out_tail = _lsoft_loss_jax(p_flat[main:], t_flat[main:], beta).astype(out_dtype)
    return jnp.concatenate([out_main, out_tail]).reshape(orig_shape)


def lsoft_loss_ref(y_pred, y_true, beta):
    p = y_pred.astype(jnp.float32)
    t = y_true.astype(jnp.float32)
    t_upd = (beta * t + (1.0 - beta) * p) * t
    log_p = jnp.maximum(jnp.log(p), -100.0)
    log_1mp = jnp.maximum(jnp.log(1.0 - p), -100.0)
    return -(t_upd * log_p + (1.0 - t_upd) * log_1mp)


if __name__ == "__main__":
    key = jax.random.PRNGKey(0)
    ks = jax.random.split(key, 8)
    beta = 0.7

    # Case 1: (2,4,16,16) f32 -> 2048 elems, lane-aligned fast path (no copies).
    shape1 = (2, 4, 16, 16)
    p1 = jax.nn.sigmoid(jax.random.normal(ks[0], shape1, jnp.float32))
    t1 = (jax.random.uniform(ks[1], shape1) > 0.5).astype(jnp.float32)
    o1 = jax.block_until_ready(lsoft_loss(p1, t1, beta))
    r1 = lsoft_loss_ref(p1, t1, jnp.float32(beta))
    assert o1.shape == shape1 and o1.dtype == jnp.float32
    assert jnp.allclose(o1, r1, atol=1e-5, rtol=1e-5)

    # Case 2: (5,128) f32 -> last-dim-aligned fast path, full-extent odd rows.
    shape2 = (5, 128)
    p2 = jax.nn.sigmoid(jax.random.normal(ks[2], shape2, jnp.float32))
    t2 = (jax.random.uniform(ks[3], shape2) > 0.5).astype(jnp.float32)
    o2 = jax.block_until_ready(lsoft_loss(p2, t2, beta))
    r2 = lsoft_loss_ref(p2, t2, jnp.float32(beta))
    assert o2.shape == shape2
    assert jnp.allclose(o2, r2, atol=1e-5, rtol=1e-5)

    # Case 3: (3,500) f32 -> ragged: kernel on 1024-elem prefix, tail in JAX.
    shape3 = (3, 500)
    p3 = jax.nn.sigmoid(jax.random.normal(ks[4], shape3, jnp.float32))
    t3 = (jax.random.uniform(ks[5], shape3) > 0.5).astype(jnp.float32)
    o3 = jax.block_until_ready(lsoft_loss(p3, t3, beta))
    r3 = lsoft_loss_ref(p3, t3, jnp.float32(beta))
    assert o3.shape == shape3
    assert jnp.allclose(o3, r3, atol=1e-5, rtol=1e-5)

    # Case 4: bf16 inputs are DMA'd natively (no wrapper cast), bf16 output.
    shape4 = (8, 256)
    p4 = jax.nn.sigmoid(jax.random.normal(ks[6], shape4, jnp.float32)).astype(jnp.bfloat16)
    t4 = (jax.random.uniform(ks[7], shape4) > 0.5).astype(jnp.bfloat16)
    o4 = jax.block_until_ready(lsoft_loss(p4, t4, beta))
    r4 = lsoft_loss_ref(p4, t4, jnp.float32(beta))
    assert o4.shape == shape4 and o4.dtype == jnp.bfloat16
    assert jnp.allclose(o4.astype(jnp.float32), r4, atol=2e-2, rtol=2e-2)

    print("KERNEL_OK")
</pallas_src>

<mosaic_0001>
module attributes {stable_mosaic.version = 11 : i64} {
  func.func @lsoft_loss_kernel(%arg0: i32, %arg1: memref<1xf32, #tpu.memory_space<smem>>, %arg2: memref<2x1024xf32, #tpu.memory_space<vmem>>, %arg3: memref<2x1024xf32, #tpu.memory_space<vmem>>, %arg4: memref<2x1024xf32, #tpu.memory_space<vmem>>) attributes {dimension_semantics = [#tpu.dimension_semantics<parallel>], iteration_bounds = array<i64: 1>, scalar_prefetch = 0 : i64, scratch_operands = 0 : i64, tpu.core_type = #tpu.core_type<tc>, window_params = [{transform_indices = @transform_0, window_bounds = array<i64: 1>}, {transform_indices = @transform_1, window_bounds = array<i64: 2, 1024>}, {transform_indices = @transform_2, window_bounds = array<i64: 2, 1024>}, {transform_indices = @transform_3, window_bounds = array<i64: 2, 1024>}]} {
    %c0 = arith.constant 0 : index
    %0 = memref.load %arg1[%c0] : memref<1xf32, #tpu.memory_space<smem>>
    %c0_0 = arith.constant 0 : index
    %c0_1 = arith.constant 0 : index
    %1 = vector.load %arg2[%c0_0, %c0_1] : memref<2x1024xf32, #tpu.memory_space<vmem>>, vector<2x1024xf32>
    %c0_2 = arith.constant 0 : index
    %c0_3 = arith.constant 0 : index
    %2 = vector.load %arg3[%c0_2, %c0_3] : memref<2x1024xf32, #tpu.memory_space<vmem>>, vector<2x1024xf32>
    %3 = vector.broadcast %0 : f32 to vector<2x1024xf32>
    %4 = arith.mulf %3, %2 : vector<2x1024xf32>
    %cst = arith.constant 1.000000e+00 : f32
    %5 = arith.subf %cst, %0 : f32
    %6 = vector.broadcast %5 : f32 to vector<2x1024xf32>
    %7 = arith.mulf %6, %1 : vector<2x1024xf32>
    %8 = arith.addf %4, %7 : vector<2x1024xf32>
    %9 = arith.mulf %8, %2 : vector<2x1024xf32>
    %10 = math.log %1 : vector<2x1024xf32>
    %cst_4 = arith.constant -1.000000e+02 : f32
    %11 = vector.broadcast %cst_4 : f32 to vector<2x1024xf32>
    %12 = arith.maximumf %10, %11 : vector<2x1024xf32>
    %cst_5 = arith.constant 1.000000e+00 : f32
    %13 = vector.broadcast %cst_5 : f32 to vector<2x1024xf32>
    %14 = arith.subf %13, %1 : vector<2x1024xf32>
    %15 = math.log %14 : vector<2x1024xf32>
    %cst_6 = arith.constant -1.000000e+02 : f32
    %16 = vector.broadcast %cst_6 : f32 to vector<2x1024xf32>
    %17 = arith.maximumf %15, %16 : vector<2x1024xf32>
    %cst_7 = arith.constant 0.000000e+00 : f32
    %18 = vector.broadcast %cst_7 : f32 to vector<2x1024xf32>
    %19 = arith.subf %18, %17 : vector<2x1024xf32>
    %20 = arith.subf %12, %17 : vector<2x1024xf32>
    %21 = arith.mulf %9, %20 : vector<2x1024xf32>
    %22 = arith.subf %19, %21 : vector<2x1024xf32>
    %c0_8 = arith.constant 0 : index
    %c0_9 = arith.constant 0 : index
    %23 = vector.load %arg4[%c0_8, %c0_9] : memref<2x1024xf32, #tpu.memory_space<vmem>>, vector<2x1024xf32>
    tpu.vector_store %arg4[%c0_8, %c0_9], %22 {strides = array<i32>} : memref<2x1024xf32, #tpu.memory_space<vmem>>, vector<2x1024xf32>,
    return
  }
  func.func @transform_0(%arg0: i32) -> i32 {
    %c0_i32 = arith.constant 0 : i32
    %c0_i32_0 = arith.constant 0 : i32
    return %c0_i32 : i32
  }
  func.func @transform_1(%arg0: i32) -> (i32, i32) {
    %c0_i32 = arith.constant 0 : i32
    %c0_i32_0 = arith.constant 0 : i32
    return %arg0, %c0_i32 : i32, i32
  }
  func.func @transform_2(%arg0: i32) -> (i32, i32) {
    %c0_i32 = arith.constant 0 : i32
    %c0_i32_0 = arith.constant 0 : i32
    return %arg0, %c0_i32 : i32, i32
  }
  func.func @transform_3(%arg0: i32) -> (i32, i32) {
    %c0_i32 = arith.constant 0 : i32
    %c0_i32_0 = arith.constant 0 : i32
    return %arg0, %c0_i32 : i32, i32
  }
}

</mosaic_0001>

<bundles_post_ra>
// kernel: tpu_custom_call.1
= control target key start
LH: loop header
LB: loop body
LE: loop exit
PB: predicated region body
PF: predicated region fallthrough
CT: control target
= control target key end

     0   :  { %9 = vsyncpa [#allocation4], 0  ;;  %s244_s0 = inlined_call_operand.<no memory space> [shape: f32[1], index: 0, kind: input, shape index: {}]   ;;  %s245_s1 = inlined_call_operand.hbm [shape: f32[2,1024], index: 1, kind: input, shape index: {}]   ;;  %s246_s2 = inlined_call_operand.hbm [shape: f32[2,1024], index: 2, kind: input, shape index: {}]   ;;  %s247_s3 = inlined_call_operand.hbm [shape: f32[2,1024], index: 3, kind: output, shape index: {}]  }
   0x1   :  { %10 = vsyncpa [#allocation7], 0 }
   0x2   :  { %11 = vsyncpa [#allocation5], 0  ;;  %s179_s12 = smov [#allocation3]   ;;  %s180_s14 = smov [#allocation6]  }
   0x3   :  { %s20_s13 = sshll.u32 %s179_s12, 4  ;;  %s30_s15 = sshll.u32 %s180_s14, 4  ;;  %s21_s13 = int_to_ptr.vmem [resolvable:$true] %s20_s13  ;;  %s31_s15 = int_to_ptr.vmem [resolvable:$true] %s30_s15 }
   0x4   :  { %s107_s18 = scalar_lea.hbm %s245_s1, 256 }
   0x5   :  { %p108_p0 = scmp.ne.s32.totalorder %s245_s1, %s107_s18  ;;  %p111_p1 = scmp.lt.u32.totalorder %s107_s18, %s245_s1 }
   0x7   :  { %p113_p2 = pnand %p111_p1, %p108_p0 }
   0x9   :  { %116 = shalt.err (!%p113_p2)
}
   0xa   :  { %s117_s23 = scalar_lea.vmem %s21_s13, 256  ;;  %p122_p4 = scmp.lt.s32.totalorder %s21_s13, %s21_s13 }
   0xb   :  { %p118_p3 = scmp.ne.s32.totalorder %s21_s13, %s117_s23  ;;  %p123_p5 = scmp.lt.s32.totalorder %s117_s23, %s117_s23 }
   0xd   :  { %p124_p6 = por %p123_p5, %p122_p4 }
   0xf   :  { %p125_p7 = pnand %p124_p6, %p118_p3 }
  0x11   :  { %128 = shalt.err (!%p125_p7)
}
  0x12   :  { %23 = dma.hbm_to_vmem [thread:$0]  %s245_s1, 256, %s21_s13, [#allocation4]  }
  0x13   :  { %s129_s28 = scalar_lea.hbm %s246_s2, 256 }
  0x14   :  { %p130_p8 = scmp.ne.s32.totalorder %s246_s2, %s129_s28  ;;  %p133_p9 = scmp.lt.u32.totalorder %s129_s28, %s246_s2 }
  0x16   :  { %p135_p10 = pnand %p133_p9, %p130_p8 }
  0x18   :  { %138 = shalt.err (!%p135_p10)
}
  0x19   :  { %s139_s6 = scalar_lea.vmem %s31_s15, 256  ;;  %p144_p12 = scmp.lt.s32.totalorder %s31_s15, %s31_s15 }
  0x1a   :  { %p140_p11 = scmp.ne.s32.totalorder %s31_s15, %s139_s6  ;;  %p145_p13 = scmp.lt.s32.totalorder %s139_s6, %s139_s6 }
  0x1c   :  { %p146_p0 = por %p145_p13, %p144_p12 }
  0x1e   :  { %p147_p1 = pnand %p146_p0, %p140_p11 }
  0x20   :  { %150 = shalt.err (!%p147_p1)
}
  0x21   :  { %33 = dma.hbm_to_vmem [thread:$0]  %s246_s2, 256, %s31_s15, [#allocation7]  }
  0x22   :  { %173 = dma.done.wait [#allocation4], 256  }
  0x23   :  { %174 = vsyncadd [#allocation4], 4294967040 }
  0x24   :  { %175 = dma.done.wait [#allocation7], 256  }
  0x25   :  { %176 = vsyncadd [#allocation7], 4294967040  ;;  %v41_v0 = vld [vmem:[#allocation3] sm:$0xff]  ;;  %v42_v1 = vld [vmem:[#allocation3 + $0x8] sm:$0xff]  ;;  %s48_s10 = ssub.f32 1.0, %s244_s0  ;;  %v45_v5 = vstv %s244_s0  ;;  %s181_s0 = smov [#allocation8]  }
  0x26   :  { %99 = vlog2.f32 %v41_v0  ;;  %v62_v2 = vsub.f32 1.0, %v41_v0  ;;  %v63_v3 = vsub.f32 1.0, %v42_v1  ;;  %v43_v4 = vld [vmem:[#allocation6] sm:$0xff]  ;;  %v44_v7 = vld [vmem:[#allocation6 + $0x8] sm:$0xff]  ;;  %s86_s2 = sshll.u32 %s181_s0, 4  ;;  %s87_s2 = int_to_ptr.vmem [resolvable:$true] %s86_s2 }
  0x27   :  { %101 = vlog2.f32 %v42_v1  ;;  %v49_v6 = vstv %s48_s10  ;;  %v46_v8 = vmul.f32 %v45_v5, %v43_v4  ;;  %v47_v10 = vmul.f32 %v45_v5, %v44_v7  ;;  %s151_s13 = scalar_lea.vmem %s87_s2, 256  ;;  %p156_p3 = scmp.lt.s32.totalorder %s87_s2, %s87_s2 }
  0x28   :  { %103 = vlog2.f32 %v62_v2  ;;  %v50_v9 = vmul.f32 %v49_v6, %v41_v0  ;;  %v51_v11 = vmul.f32 %v49_v6, %v42_v1  ;;  %p152_p2 = scmp.ne.s32.totalorder %s87_s2, %s151_s13  ;;  %p157_p4 = scmp.lt.s32.totalorder %s151_s13, %s151_s13 }
  0x29   :  { %105 = vlog2.f32 %v63_v3 }
  0x2a   :  { %v52_v14 = vadd.f32 %v50_v9, %v46_v8  ;;  %v53_v17 = vadd.f32 %v51_v11, %v47_v10  ;;  %p158_p5 = por %p157_p4, %p156_p3 }
  0x2c   :  { %v54_v24 = vmul.f32 %v52_v14, %v43_v4  ;;  %v55_v26 = vmul.f32 %v53_v17, %v44_v7  ;;  %p159_p6 = pnand %p158_p5, %p152_p2 }
  0x30   :  { %v100_v12 = vpop.eup %99 }
  0x31   :  { %v102_v13 = vpop.eup %101  ;;  %v57_v15 = vmul.f32 0.6931472, %v100_v12 }
  0x32   :  { %v104_v16 = vpop.eup %103  ;;  %v59_v18 = vmul.f32 0.6931472, %v102_v13 }
  0x33   :  { %v106_v19 = vpop.eup %105  ;;  %v60_v20 = vmax.f32 %v57_v15, -100.0  ;;  %v65_v21 = vmul.f32 0.6931472, %v104_v16 }
  0x34   :  { %v61_v22 = vmax.f32 %v59_v18, -100.0  ;;  %v67_v23 = vmul.f32 0.6931472, %v106_v19 }
  0x35   :  { %v68_v25 = vmax.f32 %v65_v21, -100.0 }
  0x36   :  { %v69_v27 = vmax.f32 %v67_v23, -100.0 }
  0x37   :  { %v70_v28 = vsub.f32 0.0, %v68_v25  ;;  %v72_v29 = vsub.f32 %v60_v20, %v68_v25 }
  0x38   :  { %v71_v30 = vsub.f32 0.0, %v69_v27  ;;  %v73_v31 = vsub.f32 %v61_v22, %v69_v27 }
  0x39   :  { %v74_v32 = vmul.f32 %v72_v29, %v54_v24 }
  0x3a   :  { %v75_v33 = vmul.f32 %v73_v31, %v55_v26 }
  0x3b   :  { %v76_v34 = vsub.f32 %v70_v28, %v74_v32 }
  0x3c   :  { %v77_v35 = vsub.f32 %v71_v30, %v75_v33 }
  0x3d   :  { %78 = vst [vmem:[#allocation8] sm:$0xff] %v76_v34 }
  0x3e   :  { %79 = vst [vmem:[#allocation8 + $0x8] sm:$0xff] %v77_v35 }
  0x3f   :  { %162 = shalt.err (!%p159_p6)
}
  0x40   :  { %s163_s16 = scalar_lea.hbm %s247_s3, 256 }
  0x41   :  { %p164_p7 = scmp.ne.s32.totalorder %s247_s3, %s163_s16  ;;  %p167_p8 = scmp.lt.u32.totalorder %s163_s16, %s247_s3 }
  0x43   :  { %p169_p9 = pnand %p167_p8, %p164_p7 }
  0x45   :  { %172 = shalt.err (!%p169_p9)
}
  0x46   :  { %89 = dma.vmem_to_hbm [thread:$0]  %s87_s2, 256, %s247_s3, [#allocation5]  }
  0x47   :  { %177 = dma.done.wait [#allocation5], 256  }
  0x48   :  { %178 = vsyncadd [#allocation5], 4294967040 }
  0x49   :  { %93 = vsyncpa [#allocation4], 1 }
  0x4a   :  { %94 = vsyncpa [#allocation7], 1 }
  0x4b   :  { %95 = vsyncpa [#allocation5], 1 }

</bundles_post_ra>
